<compile_context>
chip_gen: v5e
topology: v5e:2x2
jax: 0.10.0
libtpu: 0.0.40
codegen_flags: <defaults>
</compile_context>

<pallas_src>
import numpy as np
import jax
import jax.numpy as jnp
from jax.experimental import pallas as pl
from jax.experimental.pallas import tpu as pltpu


# ----------------------------- Pallas kernel --------------------------------
def _greybox_kernel(lr_ref,             # SMEM (2,)  : [L_param, R_param] (log-space), scalar-prefetched
                    x_ref,              # VMEM (TB, dim_x)
                    z_ref,              # VMEM (TB, dim_z)
                    w1_ref, b1_ref,     # VMEM (din, H), (1, H)
                    w2_ref, b2_ref,     # VMEM (H, H),   (1, H)
                    w3t_ref, b3_ref,    # VMEM (1, H),   (1, 1)   (w3 pre-transposed)
                    out_ref):           # VMEM (TB, 2)
    # ---- physics scalars first (SMEM reads + EUP exp, hoisted above matmul) ----
    inv_L = jnp.exp(-lr_ref[0])        # 1/L as exp(-L_param): multiply instead of divide
    R = jnp.exp(lr_ref[1])

    x = x_ref[...]                      # (TB, dim_x)
    z = z_ref[...]                      # (TB, dim_z)
    dim_x = x.shape[1]
    dim_z = z.shape[1]

    # ---- Layer 1: (TB, din) @ (din, H) with din = 4 done as broadcast FMAs (VPU) ----
    acc = x[:, 0:1] * w1_ref[0:1, :]                               # (TB, H)
    for k in range(1, dim_x):
        acc = acc + x[:, k:k + 1] * w1_ref[k:k + 1, :]
    for k in range(dim_z):
        acc = acc + z[:, k:k + 1] * w1_ref[dim_x + k:dim_x + k + 1, :]
    h1 = jnp.tanh(acc + b1_ref[...])                               # (TB, H)

    # ---- Layer 2: the only MXU matmul (H x H) ----
    h2 = jnp.tanh(
        jnp.dot(h1, w2_ref[...], preferred_element_type=jnp.float32) + b2_ref[...])

    # ---- Layer 3: (H -> 1) as broadcast-mul + lane reduce (VPU/XLU, no N=1 MXU pass) ----
    d_v_out = jnp.sum(h2 * w3t_ref[...], axis=-1, keepdims=True) + b3_ref[...]   # (TB, 1)

    # ---- Physics term (elementwise, VPU) ----
    v_in = x[:, 0:1]    # x[..., 0]   (x[..., 1] == i_out feeds only the NN)
    v_out = z[:, 0:1]   # z[..., 0]
    i_in = z[:, 1:2]    # z[..., 1]
    d_i_in = (v_in - R * i_in - v_out) * inv_L                     # (TB, 1)

    # ---- Direct slice stores (no concatenate / no extra VMEM temp) ----
    out_ref[:, 0:1] = d_v_out.astype(out_ref.dtype)
    out_ref[:, 1:2] = d_i_in.astype(out_ref.dtype)


# ------------------------------ Wrapper --------------------------------------
def _round_up(n, m):
    return ((n + m - 1) // m) * m


def greybox_ode2_forward(x, z, params, *, batch_tile=1024):
    """x: (B, dim_x) f32, z: (B, dim_z) f32 -> z_dot: (B, 2) f32."""
    lr = params["lr"].astype(jnp.float32)          # (2,)  [L_param, R_param]
    w1, b1 = params["w1"], params["b1"]            # (din, H), (1, H)
    w2, b2 = params["w2"], params["b2"]            # (H, H),   (1, H)
    w3, b3 = params["w3"], params["b3"]            # (H, 1),   (1, 1)
    w3t = w3.reshape(1, -1)                        # (1, H) for the VPU reduce (128 B, free)

    x = x.astype(jnp.float32)
    z = z.astype(jnp.float32)

    B, dim_x = x.shape
    dim_z = z.shape[1]
    din, H = w1.shape

    # Batch tile: multiple of 8 sublanes, capped so the per-step working set
    # stays far below the scoped-VMEM limit on every generation (v7x: 64 MiB).
    TB = min(batch_tile, _round_up(B, 8))
    num_blocks = pl.cdiv(B, TB)

    const = lambda i, lr_ref: (0, 0)   # weights resident in VMEM across the grid

    grid_spec = pltpu.PrefetchScalarGridSpec(
        num_scalar_prefetch=1,                     # lr -> SMEM
        grid=(num_blocks,),
        in_specs=[
            pl.BlockSpec((TB, dim_x), lambda i, lr_ref: (i, 0)),
            pl.BlockSpec((TB, dim_z), lambda i, lr_ref: (i, 0)),
            pl.BlockSpec((din, H), const),
            pl.BlockSpec((1, H), const),
            pl.BlockSpec((H, H), const),
            pl.BlockSpec((1, H), const),
            pl.BlockSpec((1, H), const),
            pl.BlockSpec((1, 1), const),
        ],
        out_specs=pl.BlockSpec((TB, 2), lambda i, lr_ref: (i, 0)),
    )

    return pl.pallas_call(
        _greybox_kernel,
        out_shape=jax.ShapeDtypeStruct((B, 2), jnp.float32),
        grid_spec=grid_spec,
        compiler_params=pltpu.CompilerParams(
            dimension_semantics=("parallel",),     # megacore sharding on v7x
        ),
    )(lr, x, z, w1, b1, w2, b2, w3t, b3)


# ----------------------- Deterministic parameter init ------------------------
def init_params(dim_x, dim_z, hidden_size, L=1e-3, R=10e-2, seed=0):
    key = jax.random.PRNGKey(seed)
    k1, k2, k3, k4, k5, k6 = jax.random.split(key, 6)
    din = dim_x + dim_z

    def linear(kw, kb, fan_in, fan_out):
        bound = 1.0 / np.sqrt(fan_in)
        w = jax.random.uniform(kw, (fan_in, fan_out), jnp.float32, -bound, bound)
        b = jax.random.uniform(kb, (1, fan_out), jnp.float32, -bound, bound)
        return w, b

    w1, b1 = linear(k1, k2, din, hidden_size)
    w2, b2 = linear(k3, k4, hidden_size, hidden_size)
    w3, b3 = linear(k5, k6, hidden_size, 1)
    lr = jnp.array([np.log(L), np.log(R)], dtype=jnp.float32)
    return {"lr": lr, "w1": w1, "b1": b1, "w2": w2, "b2": b2, "w3": w3, "b3": b3}


# -------------------------- Pure-JAX reference --------------------------------
def greybox_ode2_ref(x, z, params):
    xz = jnp.concatenate([x, z], axis=-1)
    h1 = jnp.tanh(xz @ params["w1"] + params["b1"])
    h2 = jnp.tanh(h1 @ params["w2"] + params["b2"])
    d_v_out = (h2 @ params["w3"] + params["b3"])[:, 0]
    L = jnp.exp(params["lr"][0])
    R = jnp.exp(params["lr"][1])
    d_i_in = (x[:, 0] - R * z[:, 1] - z[:, 0]) / L
    return jnp.stack([d_v_out, d_i_in], axis=-1)


if __name__ == "__main__":
    dim_x, dim_z, hidden_size = 2, 2, 32
    B = 8

    params = init_params(dim_x, dim_z, hidden_size, seed=0)

    key = jax.random.PRNGKey(0)
    kx, kz = jax.random.split(key)
    x = jax.random.normal(kx, (B, dim_x), jnp.float32)
    z = jax.random.normal(kz, (B, dim_z), jnp.float32)

    out = jax.block_until_ready(greybox_ode2_forward(x, z, params))

    ref = greybox_ode2_ref(x, z, params)
    np.testing.assert_allclose(np.asarray(out), np.asarray(ref), rtol=1e-4, atol=1e-4)

    print("KERNEL_OK")
</pallas_src>

<mosaic_0001>
module attributes {stable_mosaic.version = 11 : i64} {
  func.func @_greybox_kernel(%arg0: i32, %arg1: memref<2xf32, #tpu.memory_space<smem>>, %arg2: memref<8x2xf32, #tpu.memory_space<vmem>>, %arg3: memref<8x2xf32, #tpu.memory_space<vmem>>, %arg4: memref<4x32xf32, #tpu.memory_space<vmem>>, %arg5: memref<1x32xf32, #tpu.memory_space<vmem>>, %arg6: memref<32x32xf32, #tpu.memory_space<vmem>>, %arg7: memref<1x32xf32, #tpu.memory_space<vmem>>, %arg8: memref<1x32xf32, #tpu.memory_space<vmem>>, %arg9: memref<1x1xf32, #tpu.memory_space<vmem>>, %arg10: memref<8x2xf32, #tpu.memory_space<vmem>>) attributes {dimension_semantics = [#tpu.dimension_semantics<parallel>], iteration_bounds = array<i64: 1>, scalar_prefetch = 1 : i64, scratch_operands = 0 : i64, tpu.core_type = #tpu.core_type<tc>, window_params = [{transform_indices = @transform_0, window_bounds = array<i64: 8, 2>}, {transform_indices = @transform_1, window_bounds = array<i64: 8, 2>}, {pipeline_mode = #tpu.pipeline_mode<synchronous>, transform_indices = @transform_2, window_bounds = array<i64: 4, 32>}, {pipeline_mode = #tpu.pipeline_mode<synchronous>, transform_indices = @transform_3, window_bounds = array<i64: 1, 32>}, {pipeline_mode = #tpu.pipeline_mode<synchronous>, transform_indices = @transform_4, window_bounds = array<i64: 32, 32>}, {pipeline_mode = #tpu.pipeline_mode<synchronous>, transform_indices = @transform_5, window_bounds = array<i64: 1, 32>}, {pipeline_mode = #tpu.pipeline_mode<synchronous>, transform_indices = @transform_6, window_bounds = array<i64: 1, 32>}, {pipeline_mode = #tpu.pipeline_mode<synchronous>, transform_indices = @transform_7, window_bounds = array<i64: 1, 1>}, {transform_indices = @transform_8, window_bounds = array<i64: 8, 2>}]} {
    %c0 = arith.constant 0 : index
    %0 = memref.load %arg1[%c0] : memref<2xf32, #tpu.memory_space<smem>>
    %cst = arith.constant 0.000000e+00 : f32
    %1 = arith.subf %cst, %0 : f32
    %2 = math.exp %1 : f32
    %c1 = arith.constant 1 : index
    %3 = memref.load %arg1[%c1] : memref<2xf32, #tpu.memory_space<smem>>
    %4 = math.exp %3 : f32
    %c0_0 = arith.constant 0 : index
    %c0_1 = arith.constant 0 : index
    %5 = vector.load %arg2[%c0_0, %c0_1] : memref<8x2xf32, #tpu.memory_space<vmem>>, vector<8x2xf32>
    %c0_2 = arith.constant 0 : index
    %c0_3 = arith.constant 0 : index
    %6 = vector.load %arg3[%c0_2, %c0_3] : memref<8x2xf32, #tpu.memory_space<vmem>>, vector<8x2xf32>
    %7 = vector.extract_strided_slice %5 {offsets = [0, 0], sizes = [8, 1], strides = [1, 1]} : vector<8x2xf32> to vector<8x1xf32>
    %c0_4 = arith.constant 0 : index
    %c0_5 = arith.constant 0 : index
    %8 = vector.load %arg4[%c0_4, %c0_5] : memref<4x32xf32, #tpu.memory_space<vmem>>, vector<1x32xf32>
    %9 = vector.broadcast %7 : vector<8x1xf32> to vector<8x32xf32>
    %10 = vector.broadcast %8 : vector<1x32xf32> to vector<8x32xf32>
    %11 = arith.mulf %9, %10 : vector<8x32xf32>
    %12 = vector.extract_strided_slice %5 {offsets = [0, 1], sizes = [8, 1], strides = [1, 1]} : vector<8x2xf32> to vector<8x1xf32>
    %c1_6 = arith.constant 1 : index
    %c0_7 = arith.constant 0 : index
    %13 = vector.load %arg4[%c1_6, %c0_7] : memref<4x32xf32, #tpu.memory_space<vmem>>, vector<1x32xf32>
    %14 = vector.broadcast %12 : vector<8x1xf32> to vector<8x32xf32>
    %15 = vector.broadcast %13 : vector<1x32xf32> to vector<8x32xf32>
    %16 = arith.mulf %14, %15 : vector<8x32xf32>
    %17 = arith.addf %11, %16 : vector<8x32xf32>
    %18 = vector.extract_strided_slice %6 {offsets = [0, 0], sizes = [8, 1], strides = [1, 1]} : vector<8x2xf32> to vector<8x1xf32>
    %c2 = arith.constant 2 : index
    %c0_8 = arith.constant 0 : index
    %19 = vector.load %arg4[%c2, %c0_8] : memref<4x32xf32, #tpu.memory_space<vmem>>, vector<1x32xf32>
    %20 = vector.broadcast %18 : vector<8x1xf32> to vector<8x32xf32>
    %21 = vector.broadcast %19 : vector<1x32xf32> to vector<8x32xf32>
    %22 = arith.mulf %20, %21 : vector<8x32xf32>
    %23 = arith.addf %17, %22 : vector<8x32xf32>
    %24 = vector.extract_strided_slice %6 {offsets = [0, 1], sizes = [8, 1], strides = [1, 1]} : vector<8x2xf32> to vector<8x1xf32>
    %c3 = arith.constant 3 : index
    %c0_9 = arith.constant 0 : index
    %25 = vector.load %arg4[%c3, %c0_9] : memref<4x32xf32, #tpu.memory_space<vmem>>, vector<1x32xf32>
    %26 = vector.broadcast %24 : vector<8x1xf32> to vector<8x32xf32>
    %27 = vector.broadcast %25 : vector<1x32xf32> to vector<8x32xf32>
    %28 = arith.mulf %26, %27 : vector<8x32xf32>
    %29 = arith.addf %23, %28 : vector<8x32xf32>
    %c0_10 = arith.constant 0 : index
    %c0_11 = arith.constant 0 : index
    %30 = vector.load %arg5[%c0_10, %c0_11] : memref<1x32xf32, #tpu.memory_space<vmem>>, vector<1x32xf32>
    %31 = vector.broadcast %30 : vector<1x32xf32> to vector<8x32xf32>
    %32 = arith.addf %29, %31 : vector<8x32xf32>
    %33 = math.tanh %32 : vector<8x32xf32>
    %c0_12 = arith.constant 0 : index
    %c0_13 = arith.constant 0 : index
    %34 = vector.load %arg6[%c0_12, %c0_13] : memref<32x32xf32, #tpu.memory_space<vmem>>, vector<32x32xf32>
    %cst_14 = arith.constant dense<0.000000e+00> : vector<8x32xf32>
    %35 = tpu.matmul %33, %34, %cst_14 {dimension_numbers = #tpu.dot_dimension_numbers<[1], [0], [0], [1], [0, 0, 1, 1], [], []>} : vector<8x32xf32>, vector<32x32xf32>, vector<8x32xf32> -> vector<8x32xf32>
    %c0_15 = arith.constant 0 : index
    %c0_16 = arith.constant 0 : index
    %36 = vector.load %arg7[%c0_15, %c0_16] : memref<1x32xf32, #tpu.memory_space<vmem>>, vector<1x32xf32>
    %37 = vector.broadcast %36 : vector<1x32xf32> to vector<8x32xf32>
    %38 = arith.addf %35, %37 : vector<8x32xf32>
    %39 = math.tanh %38 : vector<8x32xf32>
    %c0_17 = arith.constant 0 : index
    %c0_18 = arith.constant 0 : index
    %40 = vector.load %arg8[%c0_17, %c0_18] : memref<1x32xf32, #tpu.memory_space<vmem>>, vector<1x32xf32>
    %41 = vector.broadcast %40 : vector<1x32xf32> to vector<8x32xf32>
    %42 = arith.mulf %39, %41 : vector<8x32xf32>
    %cst_19 = arith.constant dense<0.000000e+00> : vector<8xf32>
    %43 = vector.multi_reduction <add>, %42, %cst_19 [1] : vector<8x32xf32> to vector<8xf32>
    %44 = vector.shape_cast %43 : vector<8xf32> to vector<8x1xf32>
    %c0_20 = arith.constant 0 : index
    %c0_21 = arith.constant 0 : index
    %45 = vector.load %arg9[%c0_20, %c0_21] : memref<1x1xf32, #tpu.memory_space<vmem>>, vector<1x1xf32>
    %46 = vector.broadcast %45 : vector<1x1xf32> to vector<8x1xf32>
    %47 = arith.addf %44, %46 : vector<8x1xf32>
    %48 = vector.extract_strided_slice %5 {offsets = [0, 0], sizes = [8, 1], strides = [1, 1]} : vector<8x2xf32> to vector<8x1xf32>
    %49 = vector.extract_strided_slice %6 {offsets = [0, 0], sizes = [8, 1], strides = [1, 1]} : vector<8x2xf32> to vector<8x1xf32>
    %50 = vector.extract_strided_slice %6 {offsets = [0, 1], sizes = [8, 1], strides = [1, 1]} : vector<8x2xf32> to vector<8x1xf32>
    %51 = vector.broadcast %4 : f32 to vector<8x1xf32>
    %52 = arith.mulf %51, %50 : vector<8x1xf32>
    %53 = arith.subf %48, %52 : vector<8x1xf32>
    %54 = arith.subf %53, %49 : vector<8x1xf32>
    %55 = vector.broadcast %2 : f32 to vector<8x1xf32>
    %56 = arith.mulf %54, %55 : vector<8x1xf32>
    %c0_22 = arith.constant 0 : index
    %c0_23 = arith.constant 0 : index
    %57 = vector.load %arg10[%c0_22, %c0_23] : memref<8x2xf32, #tpu.memory_space<vmem>>, vector<8x1xf32>
    tpu.vector_store %arg10[%c0_22, %c0_23], %47 {strides = array<i32>} : memref<8x2xf32, #tpu.memory_space<vmem>>, vector<8x1xf32>,
    %c0_24 = arith.constant 0 : index
    %c1_25 = arith.constant 1 : index
    %58 = vector.load %arg10[%c0_24, %c1_25] : memref<8x2xf32, #tpu.memory_space<vmem>>, vector<8x1xf32>
    tpu.vector_store %arg10[%c0_24, %c1_25], %56 {strides = array<i32>} : memref<8x2xf32, #tpu.memory_space<vmem>>, vector<8x1xf32>,
    return
  }
  func.func @transform_0(%arg0: i32, %arg1: memref<2xf32, #tpu.memory_space<smem>>) -> (i32, i32) {
    %c0_i32 = arith.constant 0 : i32
    %c0_i32_0 = arith.constant 0 : i32
    return %arg0, %c0_i32 : i32, i32
  }
  func.func @transform_1(%arg0: i32, %arg1: memref<2xf32, #tpu.memory_space<smem>>) -> (i32, i32) {
    %c0_i32 = arith.constant 0 : i32
    %c0_i32_0 = arith.constant 0 : i32
    return %arg0, %c0_i32 : i32, i32
  }
  func.func @transform_2(%arg0: i32, %arg1: memref<2xf32, #tpu.memory_space<smem>>) -> (i32, i32) {
    %c0_i32 = arith.constant 0 : i32
    %c0_i32_0 = arith.constant 0 : i32
    %c0_i32_1 = arith.constant 0 : i32
    return %c0_i32, %c0_i32_0 : i32, i32
  }
  func.func @transform_3(%arg0: i32, %arg1: memref<2xf32, #tpu.memory_space<smem>>) -> (i32, i32) {
    %c0_i32 = arith.constant 0 : i32
    %c0_i32_0 = arith.constant 0 : i32
    %c0_i32_1 = arith.constant 0 : i32
    return %c0_i32, %c0_i32_0 : i32, i32
  }
  func.func @transform_4(%arg0: i32, %arg1: memref<2xf32, #tpu.memory_space<smem>>) -> (i32, i32) {
    %c0_i32 = arith.constant 0 : i32
    %c0_i32_0 = arith.constant 0 : i32
    %c0_i32_1 = arith.constant 0 : i32
    return %c0_i32, %c0_i32_0 : i32, i32
  }
  func.func @transform_5(%arg0: i32, %arg1: memref<2xf32, #tpu.memory_space<smem>>) -> (i32, i32) {
    %c0_i32 = arith.constant 0 : i32
    %c0_i32_0 = arith.constant 0 : i32
    %c0_i32_1 = arith.constant 0 : i32
    return %c0_i32, %c0_i32_0 : i32, i32
  }
  func.func @transform_6(%arg0: i32, %arg1: memref<2xf32, #tpu.memory_space<smem>>) -> (i32, i32) {
    %c0_i32 = arith.constant 0 : i32
    %c0_i32_0 = arith.constant 0 : i32
    %c0_i32_1 = arith.constant 0 : i32
    return %c0_i32, %c0_i32_0 : i32, i32
  }
  func.func @transform_7(%arg0: i32, %arg1: memref<2xf32, #tpu.memory_space<smem>>) -> (i32, i32) {
    %c0_i32 = arith.constant 0 : i32
    %c0_i32_0 = arith.constant 0 : i32
    %c0_i32_1 = arith.constant 0 : i32
    return %c0_i32, %c0_i32_0 : i32, i32
  }
  func.func @transform_8(%arg0: i32, %arg1: memref<2xf32, #tpu.memory_space<smem>>) -> (i32, i32) {
    %c0_i32 = arith.constant 0 : i32
    %c0_i32_0 = arith.constant 0 : i32
    return %arg0, %c0_i32 : i32, i32
  }
}

</mosaic_0001>

<bundles_post_ra>
// kernel: tpu_custom_call.1
= control target key start
LH: loop header
LB: loop body
LE: loop exit
PB: predicated region body
PF: predicated region fallthrough
CT: control target
= control target key end

     0   :  { %s251_s14 = smov [#allocation3]   ;;  %s356_s0 = inlined_call_operand.vmem [shape: f32[2], index: 0, kind: input, shape index: {}]   ;;  %s357_s1 = inlined_call_operand.vmem [shape: f32[8,2], index: 1, kind: input, shape index: {}]   ;;  %s358_s2 = inlined_call_operand.vmem [shape: f32[8,2], index: 2, kind: input, shape index: {}]   ;;  %s359_s3 = inlined_call_operand.vmem [shape: f32[4,32], index: 3, kind: input, shape index: {}]   ;;  %s360_s4 = inlined_call_operand.vmem [shape: f32[1,32], index: 4, kind: input, shape index: {}]   ;;  %s361_s5 = inlined_call_operand.hbm [shape: f32[32,32], index: 5, kind: input, shape index: {}]   ;;  %s362_s6 = inlined_call_operand.vmem [shape: f32[1,32], index: 6, kind: input, shape index: {}]   ;;  %s363_s7 = inlined_call_operand.vmem [shape: f32[1,32], index: 7, kind: input, shape index: {}]   ;;  %s364_s9 = inlined_call_operand.vmem [shape: f32[8,2], index: 9, kind: output, shape index: {}]   ;;  %s365_s8 = inlined_call_operand.<no memory space> [shape: f32[1,1], index: 8, kind: input, shape index: {}]  }
   0x1   :  { %s15_s11 = sshll.u32 %s356_s0, 4  ;;  %v19_v0 = vstv %s365_s8  ;;  %s16_s11 = int_to_ptr.vmem [resolvable:$true] %s15_s11 }
   0x2   :  { %20 = vst [vmem:[#allocation4] sm:$0x1] %v19_v0  ;;  %18 = dma.vmem_to_smem %s16_s11, 16, %s251_s14, [#allocation2] }
   0x3   :  { %247 = dma.done.wait [#allocation2], 16 }
   0x4   :  { %248 = vsyncadd [#allocation2], 4294967280 }
   0x5   :  { %23 = sfence }
   0x6   :  { %24 = vsyncpa [#allocation6], 0  ;;  %s37_s17 = sshll.u32 %s361_s5, 4  ;;  %s252_s18 = smov [#allocation5]   ;;  %s38_s17 = int_to_ptr.hbm [resolvable:$true] %s37_s17 }
   0x7   :  { %s39_s19 = sshll.u32 %s252_s18, 4  ;;  %s253_s0 = smov 128   ;;  %s40_s19 = int_to_ptr.vmem [resolvable:$true] %s39_s19 }
   0x8   :  { %s254_s20 = smov 8  }
   0x9   :  { %45 = dma.hbm_to_vmem [thread:$0]  %s38_s17, 512, %s40_s19, [#allocation6], %s253_s0, %s253_s0, %s254_s20  }
   0xa   :  { %249 = dma.done.wait [#allocation6], 512  }
   0xb   :  { %250 = vsyncadd [#allocation6], 4294966784  ;;  %v255_v1 = vmov 0   ;;  %s56_s8 = sld [smem:[#allocation3]]  ;;  %v67_v2 = vld [vmem:[%s357_s1] sm:$0xff]  ;;  %v256_v8 = vmov 1  }
   0xc   :  { %191 = vset.pattern.permute.xlu0 %v255_v1  ;;  %193 = vset.pattern.permute.xlu1 %v255_v1  ;;  %s177_s21 = sld [smem:[#allocation3 + $0x1]]  ;;  %v68_v3 = vld [vmem:[%s358_s2] sm:$0xff]  ;;  %s257_s26 = smov 127   ;;  %v110_v14 = vld [vmem:[#allocation5 + $0x10] sm:$0xff]  ;;  %v109_v15 = vld [vmem:[#allocation5 + $0x8] sm:$0xff]  ;;  %vm116_vm0 = vcmask 261120  }
   0xd   :  { %72 = vperm.xlu0 %191, %v67_v2   ;;  %88 = vperm.xlu1 %193, %v68_v3   ;;  %v111_v13 = vld [vmem:[#allocation5 + $0x18] sm:$0xff]  ;;  %v108_v16 = vld [vmem:[#allocation5] sm:$0xff]  ;;  %vm164_vm1 = vcmask 7168   ;;  %vm170_vm2 = vcmask 15368  }
   0xe   :  { %132 = vmatpush.msra.mxu0 %v111_v13  ;;  %v195_v19 = vld [vmem:[%s359_s3] ss:$0 sm:$0xff]  ;;  %v197_v20 = vld [vmem:[%s359_s3 + $0x1] ss:$0 sm:$0xff]  ;;  %v196_v21 = vld [vmem:[%s359_s3 + $0x2] ss:$0 sm:$0xff] }
   0xf   :  { %v198_v22 = vld [vmem:[%s359_s3 + $0x3] ss:$0 sm:$0xff]  ;;  %v199_v30 = vld [vmem:[%s360_s4] ss:$0 sm:$0xff]  ;;  %s258_s3 = smov 1  }
  0x10   :  { %133 = vmatpush.msra.mxu0 %v110_v14  ;;  %v200_v40 = vld [vmem:[%s362_s6] ss:$0 sm:$0xff] }
  0x11   :  { %s57_s25 = ssub.f32 0.0, %s56_s8  ;;  %v201_v43 = vld [vmem:[%s363_s7] ss:$0 sm:$0xff] }
  0x12   :  { %v63_v4 = vstv %s177_s21  ;;  %134 = vmatpush.msra.mxu0 %v109_v15  ;;  %v202_v47 = vld [vmem:[#allocation4] ss:$0 sm:$0xff] }
  0x13   :  { %v58_v5 = vstv %s57_s25  ;;  %v64_v6 = vmul.f32 1.442695, %v63_v4 }
  0x14   :  { %v59_v7 = vmul.f32 1.442695, %v58_v5  ;;  %135 = vmatpush.msra.mxu0 %v108_v16 }
  0x15   :  { %203 = vpow2.f32 %v64_v6  ;;  %192 = vset.pattern.permute.xlu0 %v256_v8  ;;  %194 = vset.pattern.permute.xlu1 %v256_v8 }
  0x16   :  { %205 = vpow2.f32 %v59_v7  ;;  %79 = vperm.xlu0 %192, %v67_v2   ;;  %96 = vperm.xlu1 %194, %v68_v3  }
  0x1b   :  { %v204_v9 = vpop.eup %203 }
  0x1c   :  { %v206_v10 = vpop.eup %205 }
  0x1d   :  { %179 = vpush %v206_v10 }
  0x1e   :  { %181 = vpush %v204_v9 }
  0x4e   :  { %s324_s1 = spop %179 }
  0x4f   :  { %s182_s2 = spop %181  ;;  %v162_v37 = vstv %s324_s1 }
  0x50   :  { %v154_v11 = vstv %s182_s2 }
  0x51   :  { %v155_v12 = vmul.f32 %v154_v11, %v68_v3 }
  0x53   :  { %157 = vrot.lane.b32.xlu2 %v155_v12, %s257_s26 }
  0x7f   :  { %v73_v17 = vpop.permute.xlu0 %72  ;;  %v89_v18 = vpop.permute.xlu1 %88 }
  0x80   :  { %v76_v25 = vmul.f32 %v195_v19, %v73_v17  ;;  %v92_v27 = vmul.f32 %v196_v21, %v89_v18 }
  0x88   :  { %v80_v23 = vpop.permute.xlu0 %79  ;;  %v97_v24 = vpop.permute.xlu1 %96 }
  0x89   :  { %v83_v26 = vmul.f32 %v197_v20, %v80_v23  ;;  %v100_v29 = vmul.f32 %v198_v22, %v97_v24 }
  0x8b   :  { %v84_v28 = vadd.f32 %v83_v26, %v76_v25 }
  0x8d   :  { %v93_v31 = vadd.f32 %v92_v27, %v84_v28 }
  0x8f   :  { %v101_v32 = vadd.f32 %v100_v29, %v93_v31 }
  0x91   :  { %v106_v33 = vadd.f32 %v199_v30, %v101_v32 }
  0x93   :  { %207 = vtanh.f32 %v106_v33 }
  0x99   :  { %v208_v34 = vpop.eup %207 }
  0x9a   :  { %178 = vmatmul.msk.f32.vlgmr.msra.gmra.mxu0 %vm116_vm0, %v208_v34 }
  0xad   :  { %v158_v35 = vpop.permute.xlu2 %157 }
  0xae   :  { %v160_v36 = vsub.f32 %v67_v2, %v158_v35 }
  0xb0   :  { %v161_v38 = vsub.f32 %v160_v36, %v68_v3 }
  0xb2   :  { %v163_v39 = vmul.f32 %v162_v37, %v161_v38 }
  0xb4   :  { %167 = vrot.lane.b32.xlu1 %v163_v39, %s258_s3 }
 0x117   :  { %v137_v41 = vpop.f32.mrf.mxu0 }
 0x118   :  { %v138_v42 = vadd.f32 %v200_v40, %v137_v41 }
 0x11a   :  { %209 = vtanh.f32 %v138_v42 }
 0x120   :  { %v210_v44 = vpop.eup %209 }
 0x121   :  { %v145_v45 = vmul.f32 %v210_v44, %v201_v43 }
 0x123   :  { %v146_v46 = vsel %vm116_vm0, %v145_v45, 0.0 }
 0x124   :  { %147 = vadd.xlane.f32.xlu2 %v146_v46 }
 0x126   :  { %v168_v50 = vpop.permute.xlu1 %167 }
 0x197   :  { %v148_v48 = vpop.xlane.xlu2 %147 }
 0x198   :  { %v153_v49 = vadd.f32 %v202_v47, %v148_v48 }
 0x19a   :  { %165 = vst.msk [vmem:[%s364_s9] sm:$0xff] %vm164_vm1, %v153_v49 }
 0x19b   :  { %171 = vst.msk [vmem:[%s364_s9] sm:$0xff] %vm170_vm2, %v168_v50 }
 0x19c   :  { %176 = vsyncpa [#allocation6], 1 }

</bundles_post_ra>
